<compile_context>
chip_gen: v5e
topology: v5e:2x2
jax: 0.10.0
libtpu: 0.0.40
codegen_flags: <defaults>
</compile_context>

<pallas_src>
import math

import jax
import jax.numpy as jnp
from jax.experimental import pallas as pl
from jax.experimental.pallas import tpu as pltpu


def _round_up(x, m):
    return ((x + m - 1) // m) * m


def _cdiv(a, b):
    return -(-a // b)


def mlp_kernel(x_ref, w1_ref, b1_ref, w2_ref, b2_ref, o_ref):
    # x_ref:  (D, bm)  batch-on-lanes tile (f32 or bf16 stream)
    # w1_ref: (H, D)   torch-layout weight, VMEM-resident
    # b1_ref: (H, 1)   bias column (broadcast along lanes)
    # w2_ref: (1, H)   second-layer weight row
    # b2_ref: (1, 1)   scalar bias in SMEM
    # o_ref:  (1, bm)  lane-dense output row for this batch tile
    x = x_ref[...].astype(jnp.float32)                                   # widen hides under DMA
    h = jnp.dot(w1_ref[...], x, preferred_element_type=jnp.float32)     # (H, bm)  MXU
    h = jnp.maximum(h + b1_ref[...], 0.0)                               # ReLU     VPU
    z = jnp.dot(w2_ref[...], h, preferred_element_type=jnp.float32)     # (1, bm)  MXU, no relayout
    o_ref[...] = jax.nn.sigmoid(z + b2_ref[0, 0]).astype(o_ref.dtype)   # EUP


def mlp_forward(x, w1, b1, w2, b2, *, block_rows=4096, stream_dtype=jnp.bfloat16,
                min_pallas_batch=1024):
    """Fused MLP forward: sigmoid(relu(x @ w1.T + b1) @ w2.T + b2).

    x: (B, D) f32; w1: (H, D); b1: (H,); w2: (1, H); b2: (1,)  (PyTorch nn.Linear layout).
    Returns (B, 1) f32. `stream_dtype` (default bf16) only affects the streamed x copy;
    weights and accumulation stay f32.
    """
    B, D = x.shape
    H = w1.shape[0]

    # Small-batch fallback: launch/grid overhead dominates; XLA fuses this tiny MLP fine.
    if B < max(min_pallas_batch, 128):
        return mlp_reference(x, w1, b1, w2, b2)

    # Batch-on-lanes: one fused XLA transpose(+cast); callers that can produce (D, B)
    # directly avoid this extra pass.
    xs = x.T                                     # (D, B)
    if stream_dtype is not None:
        xs = xs.astype(stream_dtype)

    # 128-aligned batch tile, capped so there are >= 2 tiles (keeps both v7x TCs busy).
    bm = max(128, min(_round_up(block_rows, 128), _round_up(_cdiv(B, 2), 128)))
    num_tiles = _cdiv(B, bm)                     # ragged last tile handled by Pallas

    out = pl.pallas_call(
        mlp_kernel,
        out_shape=jax.ShapeDtypeStruct((1, B), jnp.float32),
        grid=(num_tiles,),
        in_specs=[
            pl.BlockSpec((D, bm), lambda i: (0, i)),    # x: streamed, double-buffered
            pl.BlockSpec((H, D), lambda i: (0, 0)),     # weights stay VMEM-resident
            pl.BlockSpec((H, 1), lambda i: (0, 0)),
            pl.BlockSpec((1, H), lambda i: (0, 0)),
            pl.BlockSpec(memory_space=pltpu.MemorySpace.SMEM),  # b2 scalar
        ],
        out_specs=pl.BlockSpec((1, bm), lambda i: (0, i)),      # lane-dense output row
        compiler_params=pltpu.CompilerParams(
            dimension_semantics=("parallel",),          # shard batch tiles across TCs (v7x)
        ),
    )(xs, w1, b1.reshape(H, 1), w2.reshape(1, H), b2.reshape(1, 1))

    return out.reshape(B, 1)


def init_params(key, input_size, hidden=15, out=1):
    """Deterministic init matching PyTorch nn.Linear default (uniform +/- 1/sqrt(fan_in))."""
    k1, k2, k3, k4 = jax.random.split(key, 4)
    bound1 = 1.0 / math.sqrt(input_size)
    bound2 = 1.0 / math.sqrt(hidden)
    # PyTorch layout: (out_features, in_features).
    w1 = jax.random.uniform(k1, (hidden, input_size), jnp.float32, -bound1, bound1)
    b1 = jax.random.uniform(k2, (hidden,), jnp.float32, -bound1, bound1)
    w2 = jax.random.uniform(k3, (out, hidden), jnp.float32, -bound2, bound2)
    b2 = jax.random.uniform(k4, (out,), jnp.float32, -bound2, bound2)
    return w1, b1, w2, b2


def mlp_reference(x, w1, b1, w2, b2):
    h = jnp.maximum(x @ w1.T + b1, 0.0)
    return jax.nn.sigmoid(h @ w2.T + b2)


if __name__ == "__main__":
    # TODO(synk): only the MLP(8) head of `Net` is implemented; the GCNConv stacks, trace
    # extraction and per-batch standardization in Net.forward depend on externals
    # (GCNConv, non_perturb_train, n) that are not defined in the spec.
    key = jax.random.PRNGKey(0)
    kx1, kx2, kx3, kp = jax.random.split(key, 4)

    input_size = 8                 # Net uses MLP(8)
    w1, b1, w2, b2 = init_params(kp, input_size)

    # Small batch -> XLA fallback path (kernel overhead would dominate here).
    x_small = jax.random.normal(kx1, (16, input_size), jnp.float32)
    out_small = jax.block_until_ready(mlp_forward(x_small, w1, b1, w2, b2))
    ref_small = mlp_reference(x_small, w1, b1, w2, b2)
    assert out_small.shape == (16, 1), out_small.shape
    assert jnp.allclose(out_small, ref_small, atol=1e-5, rtol=1e-5), "small-batch mismatch"

    # Ragged batch forced through the kernel, f32 streaming (2 tiles: bm=640 -> 640+397).
    x_med = jax.random.normal(kx2, (1037, input_size), jnp.float32)
    out_med = jax.block_until_ready(
        mlp_forward(x_med, w1, b1, w2, b2, stream_dtype=None, min_pallas_batch=0))
    ref_med = mlp_reference(x_med, w1, b1, w2, b2)
    assert out_med.shape == (1037, 1), out_med.shape
    assert jnp.allclose(out_med, ref_med, atol=1e-4, rtol=1e-4), "f32 tiled-batch mismatch"

    # Larger ragged batch, default bf16 streaming of x (2 tiles: bm=2176 -> 2176+1957).
    x_big = jax.random.normal(kx3, (4133, input_size), jnp.float32)
    out_big = jax.block_until_ready(mlp_forward(x_big, w1, b1, w2, b2))
    ref_big = mlp_reference(x_big, w1, b1, w2, b2)
    assert out_big.shape == (4133, 1), out_big.shape
    assert jnp.allclose(out_big, ref_big, atol=2e-2, rtol=2e-2), "bf16 tiled-batch mismatch"

    print("KERNEL_OK")
</pallas_src>

<mosaic_0001>
module attributes {stable_mosaic.version = 11 : i64} {
  func.func @mlp_kernel(%arg0: i32, %arg1: memref<8x640xf32, #tpu.memory_space<vmem>>, %arg2: memref<15x8xf32, #tpu.memory_space<vmem>>, %arg3: memref<15x1xf32, #tpu.memory_space<vmem>>, %arg4: memref<1x15xf32, #tpu.memory_space<vmem>>, %arg5: memref<1x1xf32, #tpu.memory_space<smem>>, %arg6: memref<1x640xf32, #tpu.memory_space<vmem>>) attributes {dimension_semantics = [#tpu.dimension_semantics<parallel>], iteration_bounds = array<i64: 2>, scalar_prefetch = 0 : i64, scratch_operands = 0 : i64, tpu.core_type = #tpu.core_type<tc>, window_params = [{transform_indices = @transform_0, window_bounds = array<i64: 8, 640>}, {pipeline_mode = #tpu.pipeline_mode<synchronous>, transform_indices = @transform_1, window_bounds = array<i64: 15, 8>}, {pipeline_mode = #tpu.pipeline_mode<synchronous>, transform_indices = @transform_2, window_bounds = array<i64: 15, 1>}, {pipeline_mode = #tpu.pipeline_mode<synchronous>, transform_indices = @transform_3, window_bounds = array<i64: 1, 15>}, {transform_indices = @transform_4, window_bounds = array<i64: 1, 1>}, {transform_indices = @transform_5, window_bounds = array<i64: 1, 640>}]} {
    %c0 = arith.constant 0 : index
    %c0_0 = arith.constant 0 : index
    %0 = vector.load %arg1[%c0, %c0_0] : memref<8x640xf32, #tpu.memory_space<vmem>>, vector<8x640xf32>
    %c0_1 = arith.constant 0 : index
    %c0_2 = arith.constant 0 : index
    %1 = vector.load %arg2[%c0_1, %c0_2] : memref<15x8xf32, #tpu.memory_space<vmem>>, vector<15x8xf32>
    %cst = arith.constant dense<0.000000e+00> : vector<15x640xf32>
    %2 = tpu.matmul %1, %0, %cst {dimension_numbers = #tpu.dot_dimension_numbers<[1], [0], [0], [1], [0, 0, 1, 1], [], []>} : vector<15x8xf32>, vector<8x640xf32>, vector<15x640xf32> -> vector<15x640xf32>
    %c0_3 = arith.constant 0 : index
    %c0_4 = arith.constant 0 : index
    %3 = vector.load %arg3[%c0_3, %c0_4] : memref<15x1xf32, #tpu.memory_space<vmem>>, vector<15x1xf32>
    %4 = vector.broadcast %3 : vector<15x1xf32> to vector<15x640xf32>
    %5 = arith.addf %2, %4 : vector<15x640xf32>
    %cst_5 = arith.constant 0.000000e+00 : f32
    %6 = vector.broadcast %cst_5 : f32 to vector<15x640xf32>
    %7 = arith.maximumf %5, %6 : vector<15x640xf32>
    %c0_6 = arith.constant 0 : index
    %c0_7 = arith.constant 0 : index
    %8 = vector.load %arg4[%c0_6, %c0_7] : memref<1x15xf32, #tpu.memory_space<vmem>>, vector<1x15xf32>
    %cst_8 = arith.constant dense<0.000000e+00> : vector<1x640xf32>
    %9 = tpu.matmul %8, %7, %cst_8 {dimension_numbers = #tpu.dot_dimension_numbers<[1], [0], [0], [1], [0, 0, 1, 1], [], []>} : vector<1x15xf32>, vector<15x640xf32>, vector<1x640xf32> -> vector<1x640xf32>
    %c0_9 = arith.constant 0 : index
    %c0_10 = arith.constant 0 : index
    %10 = memref.load %arg5[%c0_9, %c0_10] : memref<1x1xf32, #tpu.memory_space<smem>>
    %11 = vector.broadcast %10 : f32 to vector<1x640xf32>
    %12 = arith.addf %9, %11 : vector<1x640xf32>
    %13 = arith.negf %12 : vector<1x640xf32>
    %14 = math.exp %13 : vector<1x640xf32>
    %cst_11 = arith.constant 1.000000e+00 : f32
    %15 = vector.broadcast %cst_11 : f32 to vector<1x640xf32>
    %16 = arith.addf %15, %14 : vector<1x640xf32>
    %17 = arith.divf %15, %16 : vector<1x640xf32>
    %c0_12 = arith.constant 0 : index
    %c0_13 = arith.constant 0 : index
    %18 = vector.load %arg6[%c0_12, %c0_13] : memref<1x640xf32, #tpu.memory_space<vmem>>, vector<1x640xf32>
    tpu.vector_store %arg6[%c0_12, %c0_13], %17 {strides = array<i32>} : memref<1x640xf32, #tpu.memory_space<vmem>>, vector<1x640xf32>,
    return
  }
  func.func @transform_0(%arg0: i32) -> (i32, i32) {
    %c0_i32 = arith.constant 0 : i32
    %c0_i32_0 = arith.constant 0 : i32
    return %c0_i32, %arg0 : i32, i32
  }
  func.func @transform_1(%arg0: i32) -> (i32, i32) {
    %c0_i32 = arith.constant 0 : i32
    %c0_i32_0 = arith.constant 0 : i32
    %c0_i32_1 = arith.constant 0 : i32
    return %c0_i32, %c0_i32_0 : i32, i32
  }
  func.func @transform_2(%arg0: i32) -> (i32, i32) {
    %c0_i32 = arith.constant 0 : i32
    %c0_i32_0 = arith.constant 0 : i32
    %c0_i32_1 = arith.constant 0 : i32
    return %c0_i32, %c0_i32_0 : i32, i32
  }
  func.func @transform_3(%arg0: i32) -> (i32, i32) {
    %c0_i32 = arith.constant 0 : i32
    %c0_i32_0 = arith.constant 0 : i32
    %c0_i32_1 = arith.constant 0 : i32
    return %c0_i32, %c0_i32_0 : i32, i32
  }
  func.func @transform_4(%arg0: i32) -> (i32, i32) {
    %c0_i32 = arith.constant 0 : i32
    %c0_i32_0 = arith.constant 0 : i32
    %c0_i32_1 = arith.constant 0 : i32
    return %c0_i32, %c0_i32_0 : i32, i32
  }
  func.func @transform_5(%arg0: i32) -> (i32, i32) {
    %c0_i32 = arith.constant 0 : i32
    %c0_i32_0 = arith.constant 0 : i32
    return %c0_i32, %arg0 : i32, i32
  }
}

</mosaic_0001>

<bundles_post_ra>
// kernel: tpu_custom_call.1
= control target key start
LH: loop header
LB: loop body
LE: loop exit
PB: predicated region body
PF: predicated region fallthrough
CT: control target
= control target key end

     0   :  { %s1268_s0 = inlined_call_operand.hbm [shape: f32[8,1037], index: 0, kind: input, shape index: {}]   ;;  %s1269_s1 = inlined_call_operand.vmem [shape: f32[15,8], index: 1, kind: input, shape index: {}]   ;;  %s1270_s2 = inlined_call_operand.vmem [shape: f32[15,1], index: 2, kind: input, shape index: {}]   ;;  %s1271_s3 = inlined_call_operand.vmem [shape: f32[1,15], index: 3, kind: input, shape index: {}]   ;;  %s1272_s4 = inlined_call_operand.<no memory space> [shape: f32[1,1], index: 4, kind: input, shape index: {}]   ;;  %s1273_s5 = inlined_call_operand.hbm [shape: f32[1,1037], index: 5, kind: output, shape index: {}]  }
   0x1   :  { %10 = sst [smem:[#allocation2]] %s1272_s4 }
   0x2   :  { %11 = vsyncpa [#allocation4], 0 }
   0x3   :  { %13 = vsyncpa [#allocation4 + $0x1], 0 }
   0x4   :  { %14 = vsyncpa [#allocation5], 0 }
   0x5   :  { %16 = vsyncpa [#allocation5 + $0x1], 0  ;;  %s999_s20 = smov 0   ;;  %s1001_s21 = smov 0  }
   0x6   :  { %s1003_s22 = smov 0   ;;  %s1005_s23 = smov 0  }
   0x7 LB: > { %s1020_s4 = sadd.s32 4294967295, %s961_s23   ;;  %s743_s24 = sadd.s32 4294967294, %s961_s23   ;;  %s961_s23 = sphi %s1005_s23, %s1297_s23   ;;  %s957_s22 = sphi %s1003_s22, %s1296_s22   ;;  %s953_s21 = sphi %s1001_s21, %s1295_s21   ;;  %s949_s20 = sphi %s999_s20, %s1294_s20  }
   0x8   : > { %s1024_s25 = sadd.s32 1, %s961_s23   ;;  %s29_s26 = sadd.s32 1, %s957_s22 }
   0x9   : > { %s26_s27 = ssub.s32 %s961_s23, %s1024_s25  ;;  %p36_p0 = scmp.ne.s32.totalorder %s957_s22, %s953_s21 }
   0xa   : > { %p27_p1 = scmp.eq.s32.totalorder %s26_s27, 0  ;;  %p37_p2 = scmp.eq.s32.totalorder %s961_s23, 0 }
   0xb   : > { %p42_p3 = scmp.ne.s32.totalorder %s953_s21, %s949_s20  ;;  %p43_p4 = scmp.eq.s32.totalorder %s1020_s4, 0 }
   0xc   : > { %s1036_s28 = scalar_select %p27_p1, %s957_s22, %s29_s26  }
   0xd   : > { %p38_p5 = por %p37_p2, %p36_p0  ;;  %p1038_p6 = por %p43_p4, %p42_p3 }
   0xe   : > { %1275 = sst [smem:[#allocation9_spill]] %s1036_s28  ;;  %p150_p7 = scmp.eq.s32.totalorder %s1020_s4, 1 }
   0xf   : > { %p156_p8 = scmp.eq.s32.totalorder %s743_s24, 1  ;;  %p1274_p11 = scmp.ge.s32.totalorder %s961_s23, 2 }
  0x10   : > { %p1043_p9 = por %p150_p7, %p36_p0 }
  0x11   : > { %p1047_p10 = por %p156_p8, %p42_p3  ;;  %184 = sbr.rel (%p1274_p11) target bundleno = 59 (0x3b), region = 32 }
  0x16   : > { %187 = sbr.rel (!%p38_p5) target bundleno = 59 (0x3b), region = 36  ;;  %s188_s7 = sand.u32 (%p38_p5), 1, %s957_s22  }
  0x17   : > { %s193_s8 = smul.u32 (%p38_p5), 5, %s961_s23  ;;  %s1059_s14 = scalar_lea.sflag (%p38_p5), [#allocation4], %s188_s7 }
  0x18   : > { %s781_s9 = smul.u32 (%p38_p5), 40, %s188_s7 }
  0x19   : > { %s194_s10 = ssub.s32 (%p38_p5), 9, %s193_s8 }
  0x1a   : > { %p195_p12 = scmp.lt.s32.totalorder (%p38_p5), %s194_s10, 5  ;;  %s192_s15 = scalar_lea.vmem (%p38_p5), [#allocation3], %s781_s9 }
  0x1c   : > { %s1299_s10 = smov (!%p195_p12, %s194_s10), 5 }
  0x1d   : > { %s746_s11 = sshll.u32 %s1299_s10, 3 }
  0x1e   : > { %s198_s12 = ssub.s32 40, %s746_s11 }
  0x1f   : > { %s199_s13 = sshll.u32 %s198_s12, 4 }
  0x20   : > { %200 = vsyncadd %s1059_s14, %s199_s13  ;;  %p1062_p13 = scmp.ne.s32.totalorder %s746_s11, 0  ;;  %s780_s17 = smul.u32 40, %s961_s23 }
  0x21   : > { %s750_s18 = sshll.u32 %s1299_s10, 7  ;;  %s1068_s19 = sshll.u32 %s192_s15, 4  ;;  %s209_s19 = int_to_ptr.vmem [resolvable:$true] %s1068_s19 }
  0x22   : > { %s203_s27 = scalar_lea.hbm %s1268_s0, %s780_s17  ;;  %s847_s9 = sshrl.u32 %s750_s18, 4 }
  0x23   : > { %s206_s7 = sshll.u32 %s203_s27, 4  ;;  %s856_s15 = scalar_lea.hbm %s1268_s0, 72  ;;  %s207_s7 = int_to_ptr.hbm [resolvable:$true] %s206_s7 }
  0x24   : > { %s845_s8 = sshra.s32 %s207_s7, 4  ;;  %s846_s8 = int_to_ptr.hbm [resolvable:$true] %s845_s8 }
  0x25   : > { %s852_s11 = scalar_lea.hbm %s846_s8, %s847_s9  ;;  %p857_p3 = scmp.lt.s32.totalorder %s846_s8, %s1268_s0 }
  0x26   : > { %p853_p0 = scmp.ne.s32.totalorder %s846_s8, %s852_s11  ;;  %p858_p4 = scmp.lt.s32.totalorder %s856_s15, %s852_s11 }
  0x28   : > { %p854_p1 = pnand %p853_p0, %p1062_p13  ;;  %p859_p5 = por %p858_p4, %p857_p3 }
  0x2a   : > { %p855_p2 = pneg %p854_p1 }
  0x2c   : > { %p860_p7 = pnand %p859_p5, %p855_p2 }
  0x2e   : > { %863 = shalt.err (!%p860_p7)
}
  0x2f   : > { %s864_s17 = sshra.s32 %s209_s19, 4  ;;  %s963_s27 = smov [#allocation3]   ;;  %s865_s17 = int_to_ptr.vmem [resolvable:$true] %s864_s17 }
  0x30   : > { %s871_s26 = scalar_lea.vmem %s865_s17, %s847_s9  ;;  %s875_s12 = scalar_lea.vmem %s963_s27, 80 }
  0x31   : > { %p872_p8 = scmp.ne.s32.totalorder %s865_s17, %s871_s26  ;;  %p877_p1 = scmp.lt.s32.totalorder %s875_s12, %s871_s26 }
  0x33   : > { %p873_p12 = pnand %p872_p8, %p1062_p13 }
  0x35   : > { %p874_p0 = pneg %p873_p12 }
  0x37   : > { %p879_p11 = pnand %p877_p1, %p874_p0 }
  0x39   : > { %882 = shalt.err (!%p879_p11)
}
  0x3a   : > { %211 = dma.hbm_to_vmem [thread:$0]  (%p1062_p13), %s207_s7, %s750_s18, %s209_s19, %s1059_s14  }
  0x3b PF: > { %p751_p2 = scmp.ge.s32.totalorder %s961_s23, 1  ;;  %p213_p3 = scmp.lt.s32.totalorder %s961_s23, 3 }
  0x3d   : > { %p214_p4 = pnand %p751_p2, %p213_p3 }
  0x3e   : > { %s1098_s28 = sand.u32 (!%p214_p4), 1, %s953_s21  }
  0x3f   : > { %217 = sbr.rel (%p214_p4) target bundleno = 426 (0x1aa), region = 40  ;;  %s220_s8 = scalar_lea.sflag (!%p214_p4), [#allocation4], %s1098_s28 }
  0x40   : > { %s782_s16 = smul.u32 (!%p214_p4), 40, %s1098_s28 }
  0x42   : > { %s223_s9 = scalar_lea.vmem (!%p214_p4), [#allocation3], %s782_s16 }
  0x44   : > { %940 = dma.done.wait (%p1038_p6), %s220_s8, 640  }
  0x45   : > { %942 = vsyncadd (%p1038_p6), %s220_s8, 4294966656  ;;  %v964_v0 = vmov 0   ;;  %v260_v1 = vld [vmem:[%s223_s9] sm:$0xff]  ;;  %v261_v2 = vld [vmem:[%s223_s9 + $0x8] sm:$0xff]  ;;  %vm279_vm0 = vcmask 64512   ;;  %vm418_vm1 = vcmask 1046528  }
  0x46   : > { %824 = vset.pattern.permute.xlu0 %v964_v0  ;;  %v262_v3 = vld [vmem:[%s223_s9 + $0x10] sm:$0xff]  ;;  %301 = vmatpush.msra.mxu0 %v260_v1  ;;  %v263_v4 = vld [vmem:[%s223_s9 + $0x18] sm:$0xff]  ;;  %v268_v6 = vld [vmem:[%s1270_s2 + $0x8] sm:$0x7f]  ;;  %vm414_vm2 = vcmask 121856   ;;  %s412_s17 = sld [smem:[#allocation2]] }
  0x47   : > { %324 = vmatpush.msra.mxu1 %v261_v2  ;;  %v265_v5 = vld [vmem:[%s1269_s1] sm:$0xff]  ;;  %347 = vmatpush.msra.mxu2 %v262_v3  ;;  %v266_v8 = vld [vmem:[%s1269_s1 + $0x8] sm:$0x7f]  ;;  %s783_s26 = smul.u32 5, %s1098_s28  ;;  %s653_s12 = scalar_lea.sflag [#allocation5], %s1098_s28 }
  0x48   : > { %370 = vmatpush.msra.mxu3 %v263_v4  ;;  %v264_v7 = vld [vmem:[%s223_s9 + $0x20] sm:$0xff]  ;;  %752 = vmatmul.msk.f32.vlgmr.msra.gmra.mxu0 %vm279_vm0, %v265_v5  ;;  %s660_s16 = smul.u32 (%p1043_p9), 5, %s1020_s4 }
  0x49   : > { %754 = vmatmul.msk.f32.vlgmr.msra.gmra.mxu1 %vm279_vm0, %v265_v5  ;;  %756 = vmatmul.msk.f32.vlgmr.msra.gmra.mxu2 %vm279_vm0, %v265_v5  ;;  %v267_v9 = vld [vmem:[%s1270_s2] sm:$0xff]  ;;  %s250_s27 = scalar_lea.vmem [#allocation6], %s783_s26 }
  0x4a   : > { %758 = vmatmul.msk.f32.vlgmr.msra.gmra.mxu3 %vm279_vm0, %v265_v5  ;;  %276 = vperm.xlu0 %824, %v268_v6   ;;  %v411_v26 = vld [vmem:[%s1271_s3] sm:$0x1]  ;;  %s661_s8 = ssub.s32 (%p1043_p9), 9, %s660_s16 }
  0x4b   : > { %393 = vmatpush.msrb.mxu0 %v264_v7  ;;  %p662_p6 = scmp.lt.s32.totalorder (%p1043_p9), %s661_s8, 5 }
  0x4c   : > { %v413_v44 = vstv %s412_s17 }
  0x50   : > { %753 = vmatmul.msk.f32.gmra.mxu0 %vm279_vm0, %v266_v8 }
  0x51   : > { %755 = vmatmul.msk.f32.gmra.mxu1 %vm279_vm0, %v266_v8  ;;  %757 = vmatmul.msk.f32.gmra.mxu2 %vm279_vm0, %v266_v8 }
  0x52   : > { %759 = vmatmul.msk.f32.gmra.mxu3 %vm279_vm0, %v266_v8  ;;  %271 = vperm.xlu0 %824, %v267_v9  }
  0x58   : > { %760 = vmatmul.msk.f32.vlgmr.msrb.gmra.mxu0 %vm279_vm0, %v265_v5 }
  0x60   : > { %761 = vmatmul.msk.f32.gmra.mxu0 %vm279_vm0, %v266_v8 }
  0xbc   : > { %v277_v10 = vpop.permute.xlu0 %276 }
  0xc4   : > { %v272_v13 = vpop.permute.xlu0 %271 }
  0xc5   : > { %v303_v11 = vpop.f32.mrf.mxu0 }
  0xc6   : > { %v326_v12 = vpop.f32.mrf.mxu1  ;;  %v304_v18 = vadd.f32 %v303_v11, %v272_v13 }
  0xc7   : > { %v327_v19 = vadd.f32 %v326_v12, %v272_v13 }
  0xc8   : > { %v401_v24 = vmax.f32 %v304_v18, 0.0 }
  0xc9   : > { %v402_v25 = vmax.f32 %v327_v19, 0.0 }
  0xcc   : > { %v349_v14 = vpop.f32.mrf.mxu2 }
  0xcd   : > { %v372_v15 = vpop.f32.mrf.mxu3  ;;  %v306_v16 = vpop.f32.mrf.mxu0  ;;  %v350_v27 = vadd.f32 %v349_v14, %v272_v13 }
  0xce   : > { %v329_v17 = vpop.f32.mrf.mxu1  ;;  %v307_v20 = vadd.f32 %v306_v16, %v277_v10  ;;  %v373_v30 = vadd.f32 %v372_v15, %v272_v13 }
  0xcf   : > { %v330_v21 = vadd.f32 %v329_v17, %v277_v10  ;;  %v403_v36 = vmax.f32 %v350_v27, 0.0 }
  0xd0   : > { %v406_v22 = vmax.f32 %v307_v20, 0.0  ;;  %v404_v37 = vmax.f32 %v373_v30, 0.0 }
  0xd1   : > { %v407_v23 = vmax.f32 %v330_v21, 0.0 }
  0xd2   : > { %762 = vmatpush.msk.msrb.mxu1 %vm418_vm1, %v406_v22 }
  0xd3   : > { %764 = vmatpush.msk.msrb.mxu2 %vm418_vm1, %v407_v23 }
  0xd4   : > { %v352_v28 = vpop.f32.mrf.mxu2  ;;  %449 = vmatpush.msrb.mxu1 %v401_v24 }
  0xd5   : > { %v375_v29 = vpop.f32.mrf.mxu3  ;;  %469 = vmatpush.msrb.mxu2 %v402_v25  ;;  %v353_v31 = vadd.f32 %v352_v28, %v277_v10  ;;  %v395_v33 = vpop.f32.mrf.mxu0  ;;  %763 = vmatmul.msk.f32.vlgmr.msrb.gmra.mxu1 %vm414_vm2, %v411_v26 }
  0xd6   : > { %v376_v32 = vadd.f32 %v375_v29, %v277_v10  ;;  %765 = vmatmul.msk.f32.vlgmr.msrb.gmra.mxu2 %vm414_vm2, %v411_v26  ;;  %v396_v39 = vadd.f32 %v395_v33, %v272_v13 }
  0xd7   : > { %v408_v34 = vmax.f32 %v353_v31, 0.0 }
  0xd8   : > { %v409_v35 = vmax.f32 %v376_v32, 0.0  ;;  %v405_v42 = vmax.f32 %v396_v39, 0.0 }
  0xd9   : > { %766 = vmatpush.msk.msrb.mxu3 %vm418_vm1, %v408_v34 }
  0xda   : > { %768 = vmatpush.msk.msra.mxu1 %vm418_vm1, %v409_v35 }
  0xdb   : > { %489 = vmatpush.msrb.mxu3 %v403_v36 }
  0xdc   : > { %509 = vmatpush.msra.mxu1 %v404_v37  ;;  %767 = vmatmul.msk.f32.vlgmr.msrb.gmra.mxu3 %vm414_vm2, %v411_v26 }
  0xdd   : > { %v398_v38 = vpop.f32.mrf.mxu0  ;;  %769 = vmatmul.msk.f32.vlgmr.msra.gmra.mxu1 %vm414_vm2, %v411_v26 }
  0xde   : > { %v399_v40 = vadd.f32 %v398_v38, %v277_v10 }
  0xe0   : > { %v410_v41 = vmax.f32 %v399_v40, 0.0 }
  0xe2   : > { %770 = vmatpush.msk.msra.mxu2 %vm418_vm1, %v410_v41 }
  0xe4   : > { %529 = vmatpush.msra.mxu2 %v405_v42 }
  0xe5   : > { %771 = vmatmul.msk.f32.vlgmr.msra.gmra.mxu2 %vm414_vm2, %v411_v26 }
 0x152   : > { %v451_v43 = vpop.f32.mrf.mxu1 }
 0x153   : > { %v452_v45 = vadd.f32 %v451_v43, %v413_v44 }
 0x155   : > { %v772_v48 = vmul.f32 -1.442695, %v452_v45 }
 0x159   : > { %v471_v46 = vpop.f32.mrf.mxu2 }
 0x15a   : > { %v472_v47 = vadd.f32 %v471_v46, %v413_v44  ;;  %v511_v49 = vpop.f32.mrf.mxu1 }
 0x15b   : > { %v512_v51 = vadd.f32 %v511_v49, %v413_v44 }
 0x15c   : > { %v773_v50 = vmul.f32 -1.442695, %v472_v47 }
 0x15d   : > { %v775_v52 = vmul.f32 -1.442695, %v512_v51 }
 0x15e   : > { %825 = vpow2.f32 %v773_v50 }
 0x15f   : > { %827 = vpow2.f32 %v772_v48  ;;  %v491_v53 = vpop.f32.mrf.mxu3 }
 0x160   : > { %829 = vpow2.f32 %v775_v52  ;;  %v492_v54 = vadd.f32 %v491_v53, %v413_v44 }
 0x162   : > { %v774_v56 = vmul.f32 -1.442695, %v492_v54 }
 0x164   : > { %v826_v55 = vpop.eup %825  ;;  %831 = vpow2.f32 %v774_v56 }
 0x165   : > { %v828_v57 = vpop.eup %827  ;;  %v550_v58 = vadd.f32 1.0, %v826_v55  ;;  %v647_v55 = vlaneseq }
 0x166   : > { %v830_v59 = vpop.eup %829  ;;  %v1141_v61 = vadd.f32 1.0, %v828_v57 }
 0x167   : > { %833 = vrcp.f32 %v550_v58  ;;  %v552_v60 = vadd.f32 1.0, %v830_v59  ;;  %vm574_vm3 = vweird.f32 %v550_v58  ;;  %v578_v19 = vand.u32 2147483647, %v550_v58 }
 0x168   : > { %v531_v62 = vpop.f32.mrf.mxu2  ;;  %v580_v21 = vand.u32 2147483648, %v550_v58  ;;  %vm559_vm9 = vweird.f32 %v1141_v61  ;;  %v563_v28 = vand.u32 2147483647, %v1141_v61  ;;  %v565_v32 = vand.u32 2147483648, %v1141_v61 }
 0x169   : > { %835 = vrcp.f32 %v552_v60  ;;  %v532_v63 = vadd.f32 %v531_v62, %v413_v44  ;;  %vm604_vm5 = vweird.f32 %v552_v60  ;;  %v608_v23 = vand.u32 2147483647, %v552_v60 }
 0x16a   : > { %v832_v0 = vpop.eup %831  ;;  %837 = vrcp.f32 %v1141_v61  ;;  %v610_v24 = vand.u32 2147483648, %v552_v60  ;;  %vm579_vm13 = vcmp.eq.f32.partialorder %v578_v19, 8.507059e+37  ;;  %v581_v37 = vor.u32 1.1754944e-38, %v580_v21 }
 0x16b   : > { %v551_v2 = vadd.f32 1.0, %v832_v0  ;;  %v776_v3 = vmul.f32 -1.442695, %v532_v63  ;;  %vm1183_vm15 = vcmp.eq.f32.partialorder %v608_v23, 8.507059e+37  ;;  %v566_v53 = vor.u32 1.1754944e-38, %v565_v32 }
 0x16c   : > { %v611_v42 = vor.u32 1.1754944e-38, %v610_v24 }
 0x16d   : > { %v834_v1 = vpop.eup %833  ;;  %839 = vrcp.f32 %v551_v2  ;;  %vm589_vm7 = vweird.f32 %v551_v2  ;;  %v593_v30 = vand.u32 2147483647, %v551_v2  ;;  %v595_v31 = vand.u32 2147483648, %v551_v2 }
 0x16e   : > { %v570_v4 = vmul.f32 %v834_v1, %v550_v58  ;;  %841 = vpow2.f32 %v776_v3  ;;  %vm575_vm4 = vweird.f32 %v834_v1 }
 0x16f   : > { %v1144_v5 = vpop.eup %835  ;;  %vm1160_vm10 = vmor %vm574_vm3, %vm575_vm4  ;;  %vm594_vm0 = vcmp.eq.f32.partialorder %v593_v30, 8.507059e+37  ;;  %v596_v45 = vor.u32 1.1754944e-38, %v595_v31  ;;  %vm1201_vm3 = vcmp.eq.f32.partialorder %v563_v28, 8.507059e+37 }
 0x170   : > { %v1146_v6 = vpop.eup %837  ;;  %v571_v7 = vsub.f32 1.0, %v570_v4  ;;  %v600_v8 = vmul.f32 %v1144_v5, %v552_v60  ;;  %vm605_vm6 = vweird.f32 %v1144_v5 }
 0x171   : > { %v555_v11 = vmul.f32 %v1146_v6, %v1141_v61  ;;  %vm1171_vm11 = vmor %vm604_vm5, %vm605_vm6  ;;  %vm560_vm12 = vweird.f32 %v1146_v6  ;;  %vm638_vm6 = vcmask 1040384  }
 0x172   : > { %v572_v14 = vmul.f32 %v834_v1, %v571_v7  ;;  %v601_v16 = vsub.f32 1.0, %v600_v8  ;;  %vm1193_vm1 = vmor %vm559_vm9, %vm560_vm12  ;;  %vm642_vm9 = vcmask 1043459  }
 0x173   : > { %v840_v9 = vpop.eup %839  ;;  %v556_v17 = vsub.f32 1.0, %v555_v11 }
 0x174   : > { %v842_v10 = vpop.eup %841  ;;  %v585_v12 = vmul.f32 %v840_v9, %v551_v2  ;;  %v573_v20 = vadd.f32 %v834_v1, %v572_v14  ;;  %v602_v22 = vmul.f32 %v1144_v5, %v601_v16  ;;  %vm590_vm8 = vweird.f32 %v840_v9 }
 0x175   : > { %v1151_v13 = vadd.f32 1.0, %v842_v10  ;;  %v557_v25 = vmul.f32 %v1146_v6, %v556_v17  ;;  %vm1179_vm14 = vmor %vm589_vm7, %vm590_vm8  ;;  %vm640_vm8 = vcmask 1041408  }
 0x176   : > { %v586_v15 = vsub.f32 1.0, %v585_v12  ;;  %v577_v33 = vsel %vm1160_vm10, %v834_v1, %v573_v20  ;;  %v603_v34 = vadd.f32 %v1144_v5, %v602_v22  ;;  %vm644_vm10 = vcmask 1042432  }
 0x177   : > { %843 = vrcp.f32 %v1151_v13  ;;  %v558_v40 = vadd.f32 %v1146_v6, %v557_v25  ;;  %v582_v44 = vsel %vm579_vm13, %v581_v37, %v577_v33  ;;  %v625_v46 = vand.u32 2147483648, %v1151_v13 }
 0x178   : > { %v587_v18 = vmul.f32 %v840_v9, %v586_v15  ;;  %v607_v48 = vsel %vm1171_vm11, %v1144_v5, %v603_v34  ;;  %v623_v50 = vand.u32 2147483647, %v1151_v13  ;;  %vm619_vm4 = vweird.f32 %v1151_v13 }
 0x179   : > { %v562_v56 = vsel %vm1193_vm1, %v1146_v6, %v558_v40  ;;  %v634_v57 = vrot.slane %v582_v44, 7  ;;  %v612_v58 = vsel %vm1183_vm15, %v611_v42, %v607_v48  ;;  %v626_v59 = vor.u32 1.1754944e-38, %v625_v46 }
 0x17a   : > { %v588_v26 = vadd.f32 %v840_v9, %v587_v18  ;;  %vm624_vm7 = vcmp.eq.f32.partialorder %v623_v50, 8.507059e+37  ;;  %v567_v63 = vsel %vm1201_vm3, %v566_v53, %v562_v56  ;;  %v636_v0 = vrot.slane %v612_v58, 5 }
 0x17b   : > { %v639_v2 = vsel %vm638_vm6, %v567_v63, %v634_v57  ;;  %vm649_vm11 = vcmp.lt.s32.totalorder %v647_v55, 640 }
 0x17c   : > { %v592_v41 = vsel %vm1179_vm14, %v840_v9, %v588_v26 }
 0x17d   : > { %v844_v27 = vpop.eup %843  ;;  %v597_v52 = vsel %vm594_vm0, %v596_v45, %v592_v41 }
 0x17e   : > { %v615_v36 = vmul.f32 %v844_v27, %v1151_v13  ;;  %vm620_vm2 = vweird.f32 %v844_v27  ;;  %v635_v60 = vrot.slane %v597_v52, 6 }
 0x17f   : > { %vm621_vm5 = vmor %vm619_vm4, %vm620_vm2 }
 0x180   : > { %v616_v43 = vsub.f32 1.0, %v615_v36  ;;  %v641_v3 = vsel %vm640_vm8, %v639_v2, %v635_v60 }
 0x182   : > { %v617_v49 = vmul.f32 %v844_v27, %v616_v43 }
 0x184   : > { %v618_v54 = vadd.f32 %v844_v27, %v617_v49 }
 0x186   : > { %v622_v61 = vsel %vm621_vm5, %v844_v27, %v618_v54 }
 0x187   : > { %v627_v62 = vsel %vm624_vm7, %v626_v59, %v622_v61 }
 0x188   : > { %v637_v1 = vrot.slane %v627_v62, 4  ;;  %659 = sbr.rel (!%p1043_p9) target bundleno = 426 (0x1aa), region = 48 }
 0x18a   : > { %v643_v4 = vsel %vm642_vm9, %v636_v0, %v637_v1 }
 0x18b   : > { %v645_v5 = vsel %vm644_vm10, %v641_v3, %v643_v4 }
 0x18c   : > { %651 = vst.msk [vmem:[%s250_s27] sm:$0x1f] %vm649_vm11, %v645_v5 }
 0x18d   : > { %s1301_s8 = smov (!%p662_p6, %s661_s8), 5 }
 0x18e   : > { %s664_s9 = ssub.s32 5, %s1301_s8 }
 0x18f   : > { %s665_s10 = sshll.u32 %s664_s9, 4 }
 0x190   : > { %666 = vsyncadd %s653_s12, %s665_s10  ;;  %p777_p11 = scmp.ne.s32.totalorder %s1301_s8, 0  ;;  %s668_s18 = scalar_lea.hbm %s1273_s5, %s660_s16 }
 0x191   : > { %s669_s19 = sshll.u32 %s1301_s8, 4  ;;  %s670_s4 = sshll.u32 %s250_s27, 4  ;;  %s1228_s4 = int_to_ptr.vmem [resolvable:$true] %s670_s4 }
 0x192   : > { %s672_s29 = sshll.u32 %s668_s18, 4  ;;  %s884_s7 = sshra.s32 %s1228_s4, 4  ;;  %s673_s29 = int_to_ptr.hbm [resolvable:$true] %s672_s29  ;;  %s885_s7 = int_to_ptr.vmem [resolvable:$true] %s884_s7 }
 0x193   : > { %s886_s11 = sshrl.u32 %s669_s19, 4  ;;  %s965_s15 = smov [#allocation6]  }
 0x194   : > { %s891_s13 = scalar_lea.vmem %s885_s7, %s886_s11  ;;  %s895_s24 = scalar_lea.vmem %s965_s15, 10 }
 0x195   : > { %p892_p9 = scmp.ne.s32.totalorder %s885_s7, %s891_s13  ;;  %p897_p7 = scmp.lt.s32.totalorder %s895_s24, %s891_s13 }
 0x197   : > { %p893_p13 = pnand %p892_p9, %p777_p11 }
 0x199   : > { %p894_p5 = pneg %p893_p13 }
 0x19b   : > { %p899_p8 = pnand %p897_p7, %p894_p5 }
 0x19d   : > { %902 = shalt.err (!%p899_p8)
}
 0x19e   : > { %s903_s17 = sshra.s32 %s673_s29, 4  ;;  %s914_s9 = scalar_lea.hbm %s1273_s5, 9  ;;  %s904_s17 = int_to_ptr.hbm [resolvable:$true] %s903_s17 }
 0x19f   : > { %s910_s26 = scalar_lea.hbm %s904_s17, %s886_s11  ;;  %p915_p2 = scmp.lt.s32.totalorder %s904_s17, %s1273_s5 }
 0x1a0   : > { %p911_p12 = scmp.ne.s32.totalorder %s904_s17, %s910_s26  ;;  %p916_p3 = scmp.lt.s32.totalorder %s914_s9, %s910_s26 }
 0x1a2   : > { %p912_p0 = pnand %p911_p12, %p777_p11  ;;  %p917_p4 = por %p916_p3, %p915_p2 }
 0x1a4   : > { %p913_p1 = pneg %p912_p0 }
 0x1a6   : > { %p918_p6 = pnand %p917_p4, %p913_p1 }
 0x1a8   : > { %921 = shalt.err (!%p918_p6)
}
 0x1a9   : > { %675 = dma.vmem_to_hbm [thread:$0]  (%p777_p11), %s1228_s4, %s669_s19, %s673_s29, %s653_s12  }
 0x1aa PF: > { %s684_s30 = sand.u32 1, %s949_s20   ;;  %p1292_p9 = scmp.ge.s32.totalorder %s961_s23, 2 }
 0x1ab   : > { %s685_s18 = scalar_lea.sflag [#allocation5], %s684_s30 }
 0x1ac   : > { %p787_p13 = pnand %p1292_p9, %p1047_p10 }
 0x1ae   : > { %p788_p5 = pneg %p787_p13 }
 0x1b0   : > { %944 = dma.done.wait (%p788_p5), %s685_s18, 80  }
 0x1b1   : > { %946 = vsyncadd (%p788_p5), %s685_s18, 4294967216  ;;  %s1293_s28 = sld [smem:[#allocation9_spill]]  ;;  %p19_p7 = scmp.ge.s32.totalorder %s1024_s25, 4  }
 0x1b2   : > { %s1294_s20 = smov %s953_s21  ;;  %s1295_s21 = smov %s957_s22 }
 0x1b3   : > { %s1297_s23 = smov %s1024_s25  ;;  %21 = sbr.rel (!%p19_p7) target bundleno = 7 (0x7), region = 85 }
 0x1b7   : > { %s1296_s22 = smov %s1293_s28 }
 0x1b8   :  { %691 = vsyncpa [#allocation4], 1 }
 0x1b9   :  { %693 = vsyncpa [#allocation4 + $0x1], 1 }
 0x1ba   :  { %694 = vsyncpa [#allocation5], 1 }
 0x1bb   :  { %696 = vsyncpa [#allocation5 + $0x1], 1 }

</bundles_post_ra>
